<compile_context>
chip_gen: v7x
topology: tpu7x:2x2x1
jax: 0.10.0
libtpu: 0.0.40
codegen_flags: <defaults>
</compile_context>

<pallas_src>
import functools

import jax
import jax.numpy as jnp
from jax.experimental import pallas as pl
from jax.experimental.pallas import tpu as pltpu


def _round_up(x, m):
    return ((x + m - 1) // m) * m


def _vmem_capacity_bytes():
    try:
        return int(pltpu.get_tpu_info().vmem_capacity_bytes)
    except Exception:
        return 64 * 1024 * 1024  # conservative fallback (v7x per-TC VMEM)


def _prenorm_linear_kernel(x_ref, w_ref, b_ref, o_ref, y_ref, *, eps):
    # LayerNorm once per row tile (first column step only); the normalized
    # rows, already cast to the MXU dtype, are cached in VMEM (y_ref) and
    # reused by every weight column tile.  gamma/beta are folded into w/b on
    # the host, so the kernel only normalizes.
    @pl.when(pl.program_id(1) == 0)
    def _():
        x = x_ref[...].astype(jnp.float32)                 # (tm, D)
        d = x.shape[-1]
        s1 = jnp.sum(x, axis=-1, keepdims=True)            # one traversal:
        s2 = jnp.sum(x * x, axis=-1, keepdims=True)        #   E[x], E[x^2]
        mean = s1 * (1.0 / d)
        var = jnp.maximum(s2 * (1.0 / d) - mean * mean, 0.0)   # biased var
        inv = jax.lax.rsqrt(var + eps)
        y_ref[...] = ((x - mean) * inv).astype(y_ref.dtype)

    # fn(normed_x): Linear tile on the MXU (bf16 operands, f32 accumulate).
    out = jnp.dot(y_ref[...], w_ref[...], preferred_element_type=jnp.float32)
    o_ref[...] = (out + b_ref[...].astype(jnp.float32)).astype(o_ref.dtype)


def prenorm_linear(x, gamma, beta, w, w_bias, *, eps=1e-12,
                   block_rows=None, block_cols=None,
                   matmul_dtype=jnp.bfloat16):
    """PreNorm(dim, fn=Linear(dim, dim)).forward(x).

    x: (B, S, D); gamma/beta: (D,) LayerNorm affine; w: (D, D) stored
    transposed so the kernel computes y @ w (== PyTorch's y @ W.T);
    w_bias: (D,).
    """
    B, S, D = x.shape
    rows = B * S
    out_dtype = x.dtype

    xi = jnp.dtype(x.dtype).itemsize
    oi = jnp.dtype(out_dtype).itemsize
    mdt = jnp.dtype(matmul_dtype) if matmul_dtype is not None else jnp.dtype(w.dtype)
    wi = mdt.itemsize
    sublane = 16 if xi < 4 else 8          # bf16 x packs two rows per sublane

    # ---- generation-aware VMEM budget --------------------------------------
    vmem_cap = _vmem_capacity_bytes()
    if vmem_cap <= 80 * 1024 * 1024:       # v7x: 64 MiB per TensorCore
        headroom = 16 * 1024 * 1024
        target_rows = 256
    else:                                  # v5e / v6e: 128 MiB
        headroom = 24 * 1024 * 1024
        target_rows = 512
    budget = vmem_cap - headroom

    def vmem_est(tm, tn):
        return (2 * tm * D * xi            # x tile, double-buffered
                + 2 * tm * tn * oi         # out tile, double-buffered
                + 2 * D * tn * wi          # weight tile (conservatively 2x)
                + 2 * tn * 4               # fused bias
                + tm * D * wi              # normalized-y VMEM scratch
                + 2 * tm * D * 4)          # f32 working copies / slack

    # ---- row tile: multiple of `sublane`, prefer an exact divisor ----------
    if block_rows is None:
        min_tn = D if (D <= 128 or D % 128 != 0) else 128
        tgt = target_rows
        while tgt > sublane and vmem_est(tgt, min_tn) > budget:
            tgt //= 2
        tgt = max(sublane, _round_up(tgt, sublane))
        if rows >= 2 * tgt:
            limit = tgt
        else:
            limit = min(tgt, max(sublane, (rows // (2 * sublane)) * sublane))
        br = None
        for c in range(limit, sublane - 1, -sublane):
            if rows % c == 0:
                br = c                      # exact divisor: no host-side pad
                break
        if br is None:
            # TODO(synk): handle the ragged last tile with an in-kernel masked
            # store instead of this (now minimal) host-side pad.
            n_tiles = max(1, pl.cdiv(rows, tgt))
            br = max(sublane, _round_up(pl.cdiv(rows, n_tiles), sublane))
        block_rows = br
    rows_p = _round_up(rows, block_rows)

    # ---- column tile: keep the whole weight resident whenever it fits ------
    if block_cols is None:
        if D <= 128 or D % 128 != 0:
            block_cols = D
        elif vmem_est(block_rows, D) <= budget:
            block_cols = D                  # weight DMA'd once, stays resident
        else:
            block_cols = 128
            for tn in (2048, 1024, 512, 256, 128):
                if D > tn and D % tn == 0 and vmem_est(block_rows, tn) <= budget:
                    block_cols = tn
                    break
    assert D % block_cols == 0, "block_cols must divide D"

    est = vmem_est(block_rows, block_cols)
    vmem_limit = int(min(max(est + est // 4, 32 * 1024 * 1024), budget))

    # ---- host-side preprocessing --------------------------------------------
    x2 = x.reshape(rows, D)
    if rows_p != rows:
        x2 = jnp.pad(x2, ((0, rows_p - rows), (0, 0)))

    # Fold the LayerNorm affine into the Linear (exact because fn is Linear):
    #   (y*gamma + beta) @ W + b  ==  y @ (gamma[:,None]*W) + (beta@W + b)
    w_f32 = w.astype(jnp.float32)
    w_fused = (gamma.astype(jnp.float32)[:, None] * w_f32).astype(mdt)
    b_fused = (beta.astype(jnp.float32) @ w_f32
               + w_bias.astype(jnp.float32)).reshape(1, D)

    grid = (rows_p // block_rows, D // block_cols)
    kernel = functools.partial(_prenorm_linear_kernel, eps=eps)

    out2 = pl.pallas_call(
        kernel,
        out_shape=jax.ShapeDtypeStruct((rows_p, D), out_dtype),
        grid_spec=pltpu.PrefetchScalarGridSpec(
            num_scalar_prefetch=0,
            grid=grid,
            in_specs=[
                # x: row tile stays resident across the inner column axis.
                pl.BlockSpec((block_rows, D), lambda i, j: (i, 0)),
                pl.BlockSpec((D, block_cols), lambda i, j: (0, j)),   # fused W
                pl.BlockSpec((1, block_cols), lambda i, j: (0, j)),   # fused b
            ],
            out_specs=pl.BlockSpec((block_rows, block_cols),
                                   lambda i, j: (i, j)),
            scratch_shapes=[pltpu.VMEM((block_rows, D), mdt)],        # y cache
        ),
        compiler_params=pltpu.CompilerParams(
            # Rows shard across TensorCores; the column axis carries the
            # normalized-y cache, so it must stay "arbitrary".
            dimension_semantics=("parallel", "arbitrary"),
            vmem_limit_bytes=vmem_limit,
        ),
    )(x2, w_fused, b_fused)

    if rows_p != rows:
        out2 = out2[:rows]
    return out2.reshape(B, S, D)


def _reference(x, gamma, beta, w, w_bias, eps=1e-12, matmul_dtype=jnp.bfloat16):
    # PyTorch semantics: LayerNorm (biased var) then Linear; matmul mirrors the
    # kernel's bf16-operand / f32-accumulate MXU precision.
    xf = x.astype(jnp.float32)
    mean = jnp.mean(xf, axis=-1, keepdims=True)
    var = jnp.mean((xf - mean) ** 2, axis=-1, keepdims=True)
    y = (xf - mean) * jax.lax.rsqrt(var + eps) * gamma + beta
    out = jnp.dot(y.astype(matmul_dtype), w.astype(matmul_dtype),
                  preferred_element_type=jnp.float32)
    return (out + w_bias).astype(x.dtype)


if __name__ == "__main__":
    key = jax.random.PRNGKey(0)
    kx, kw, kg, kb = jax.random.split(key, 4)

    # Small shapes consistent with the module: batch=2, seq=8, hidden=32.
    # (Production D should be a multiple of 128 for lane-dense stores.)
    B, S, D = 2, 8, 32
    x = jax.random.normal(kx, (B, S, D), dtype=jnp.float32)

    # Non-trivial LayerNorm affine (exercises the gamma/beta folding).
    gamma = 1.0 + 0.05 * jax.random.normal(kg, (D,), dtype=jnp.float32)
    beta = 0.05 * jax.random.normal(kb, (D,), dtype=jnp.float32)

    # fn = Linear(D, D): deterministic synthetic weights, stored transposed so
    # the kernel computes y @ w (== PyTorch's y @ W.T).
    w = jax.random.normal(kw, (D, D), dtype=jnp.float32) * 0.02
    w_bias = 0.01 * jnp.ones((D,), dtype=jnp.float32)

    out = prenorm_linear(x, gamma, beta, w, w_bias, eps=1e-12)
    out = jax.block_until_ready(out)

    ref = _reference(x, gamma, beta, w, w_bias, eps=1e-12)
    assert out.shape == (B, S, D)
    err = float(jnp.max(jnp.abs(out.astype(jnp.float32) - ref.astype(jnp.float32))))
    assert err < 5e-3, err

    print("KERNEL_OK")
</pallas_src>

<mosaic_0001>
module attributes {stable_mosaic.version = 11 : i64} {
  func.func @_prenorm_linear_kernel(%arg0: i32, %arg1: i32, %arg2: memref<8x32xf32, #tpu.memory_space<vmem>>, %arg3: memref<32x32xbf16, #tpu.memory_space<vmem>>, %arg4: memref<1x32xf32, #tpu.memory_space<vmem>>, %arg5: memref<8x32xf32, #tpu.memory_space<vmem>>, %arg6: memref<8x32xbf16, #tpu.memory_space<vmem>>) attributes {dimension_semantics = [#tpu.dimension_semantics<parallel>, #tpu.dimension_semantics<arbitrary>], iteration_bounds = array<i64: 2, 1>, scalar_prefetch = 0 : i64, scratch_operands = 1 : i64, tpu.core_type = #tpu.core_type<tc>, window_params = [{transform_indices = @transform_0, window_bounds = array<i64: 8, 32>}, {transform_indices = @transform_1, window_bounds = array<i64: 32, 32>}, {transform_indices = @transform_2, window_bounds = array<i64: 1, 32>}, {transform_indices = @transform_3, window_bounds = array<i64: 8, 32>}]} {
    %c0_i32 = arith.constant 0 : i32
    %0 = arith.cmpi eq, %arg1, %c0_i32 : i32
    %1 = arith.extui %0 : i1 to i32
    %c0_i32_0 = arith.constant 0 : i32
    %2 = arith.cmpi ne, %1, %c0_i32_0 : i32
    scf.if %2 {
      %c0_8 = arith.constant 0 : index
      %c0_9 = arith.constant 0 : index
      %10 = vector.load %arg2[%c0_8, %c0_9] : memref<8x32xf32, #tpu.memory_space<vmem>>, vector<8x32xf32>
      %cst_10 = arith.constant dense<0.000000e+00> : vector<8xf32>
      %11 = vector.multi_reduction <add>, %10, %cst_10 [1] : vector<8x32xf32> to vector<8xf32>
      %12 = vector.shape_cast %11 : vector<8xf32> to vector<8x1xf32>
      %13 = arith.mulf %10, %10 : vector<8x32xf32>
      %cst_11 = arith.constant dense<0.000000e+00> : vector<8xf32>
      %14 = vector.multi_reduction <add>, %13, %cst_11 [1] : vector<8x32xf32> to vector<8xf32>
      %15 = vector.shape_cast %14 : vector<8xf32> to vector<8x1xf32>
      %cst_12 = arith.constant 3.125000e-02 : f32
      %16 = vector.broadcast %cst_12 : f32 to vector<8x1xf32>
      %17 = arith.mulf %12, %16 : vector<8x1xf32>
      %cst_13 = arith.constant 3.125000e-02 : f32
      %18 = vector.broadcast %cst_13 : f32 to vector<8x1xf32>
      %19 = arith.mulf %15, %18 : vector<8x1xf32>
      %20 = arith.mulf %17, %17 : vector<8x1xf32>
      %21 = arith.subf %19, %20 : vector<8x1xf32>
      %cst_14 = arith.constant 0.000000e+00 : f32
      %22 = vector.broadcast %cst_14 : f32 to vector<8x1xf32>
      %23 = arith.maximumf %21, %22 : vector<8x1xf32>
      %cst_15 = arith.constant 9.99999996E-13 : f32
      %24 = vector.broadcast %cst_15 : f32 to vector<8x1xf32>
      %25 = arith.addf %23, %24 : vector<8x1xf32>
      %26 = math.rsqrt %25 : vector<8x1xf32>
      %27 = vector.broadcast %17 : vector<8x1xf32> to vector<8x32xf32>
      %28 = arith.subf %10, %27 : vector<8x32xf32>
      %29 = vector.broadcast %26 : vector<8x1xf32> to vector<8x32xf32>
      %30 = arith.mulf %28, %29 : vector<8x32xf32>
      %31 = arith.truncf %30 : vector<8x32xf32> to vector<8x32xbf16>
      %c0_16 = arith.constant 0 : index
      %c0_17 = arith.constant 0 : index
      %32 = vector.load %arg6[%c0_16, %c0_17] : memref<8x32xbf16, #tpu.memory_space<vmem>>, vector<8x32xbf16>
      tpu.vector_store %arg6[%c0_16, %c0_17], %31 {strides = array<i32>} : memref<8x32xbf16, #tpu.memory_space<vmem>>, vector<8x32xbf16>,
    } else {
    }
    %c0 = arith.constant 0 : index
    %c0_1 = arith.constant 0 : index
    %3 = vector.load %arg6[%c0, %c0_1] : memref<8x32xbf16, #tpu.memory_space<vmem>>, vector<8x32xbf16>
    %c0_2 = arith.constant 0 : index
    %c0_3 = arith.constant 0 : index
    %4 = vector.load %arg3[%c0_2, %c0_3] : memref<32x32xbf16, #tpu.memory_space<vmem>>, vector<32x32xbf16>
    %cst = arith.constant dense<0.000000e+00> : vector<8x32xf32>
    %5 = tpu.matmul %3, %4, %cst {dimension_numbers = #tpu.dot_dimension_numbers<[1], [0], [0], [1], [0, 0, 1, 1], [], []>} : vector<8x32xbf16>, vector<32x32xbf16>, vector<8x32xf32> -> vector<8x32xf32>
    %c0_4 = arith.constant 0 : index
    %c0_5 = arith.constant 0 : index
    %6 = vector.load %arg4[%c0_4, %c0_5] : memref<1x32xf32, #tpu.memory_space<vmem>>, vector<1x32xf32>
    %7 = vector.broadcast %6 : vector<1x32xf32> to vector<8x32xf32>
    %8 = arith.addf %5, %7 : vector<8x32xf32>
    %c0_6 = arith.constant 0 : index
    %c0_7 = arith.constant 0 : index
    %9 = vector.load %arg5[%c0_6, %c0_7] : memref<8x32xf32, #tpu.memory_space<vmem>>, vector<8x32xf32>
    tpu.vector_store %arg5[%c0_6, %c0_7], %8 {strides = array<i32>} : memref<8x32xf32, #tpu.memory_space<vmem>>, vector<8x32xf32>,
    return
  }
  func.func @transform_0(%arg0: i32, %arg1: i32) -> (i32, i32) {
    %c0_i32 = arith.constant 0 : i32
    %c0_i32_0 = arith.constant 0 : i32
    return %arg0, %c0_i32 : i32, i32
  }
  func.func @transform_1(%arg0: i32, %arg1: i32) -> (i32, i32) {
    %c0_i32 = arith.constant 0 : i32
    %c0_i32_0 = arith.constant 0 : i32
    return %c0_i32, %arg1 : i32, i32
  }
  func.func @transform_2(%arg0: i32, %arg1: i32) -> (i32, i32) {
    %c0_i32 = arith.constant 0 : i32
    %c0_i32_0 = arith.constant 0 : i32
    return %c0_i32, %arg1 : i32, i32
  }
  func.func @transform_3(%arg0: i32, %arg1: i32) -> (i32, i32) {
    %c0_i32 = arith.constant 0 : i32
    return %arg0, %arg1 : i32, i32
  }
}

</mosaic_0001>

<bundles_post_ra>
// kernel: tpu_custom_call.1
= control target key start
LH: loop header
LB: loop body
LE: loop exit
PB: predicated region body
PF: predicated region fallthrough
CT: control target
= control target key end

     0   :  { %8 = vsyncpa [#allocation4], 0  ;;  %s959_s0 = inlined_call_operand.hbm [shape: f32[16,32], index: 0, kind: input, shape index: {}]   ;;  %s960_s1 = inlined_call_operand.hbm [shape: bf16[32,32], index: 1, kind: input, shape index: {}]   ;;  %s961_s2 = inlined_call_operand.vmem [shape: f32[1,32], index: 2, kind: input, shape index: {}]   ;;  %s962_s3 = inlined_call_operand.hbm [shape: f32[16,32], index: 3, kind: output, shape index: {}]  }
   0x1   :  { %10 = vsyncpa [#allocation4 + $0x1], 0 }
   0x2   :  { %11 = vsyncpa [#allocation7], 0 }
   0x3   :  { %12 = vsyncpa [#allocation5], 0 }
   0x4   :  { %14 = vsyncpa [#allocation5 + $0x1], 0  ;;  %s734_s12 = smov 0   ;;  %s736_s13 = smov 0  }
   0x5   :  { %s738_s14 = smov 0   ;;  %s740_s15 = smov 0  }
   0x6   :  { %s742_s16 = smov 0   ;;  %s744_s17 = smov 0  }
   0x7 LB: > { %s449_s18 = sadd.s32 4294967295, %s705_s17   ;;  %s450_s19 = sadd.s32 4294967294, %s705_s17   ;;  %s705_s17 = sphi %s744_s17, %s20_s17   ;;  %s701_s16 = sphi %s742_s16, %s986_s16   ;;  %s697_s15 = sphi %s740_s15, %s985_s15   ;;  %s693_s14 = sphi %s738_s14, %s984_s14   ;;  %s689_s13 = sphi %s736_s13, %s983_s13   ;;  %s685_s12 = sphi %s734_s12, %s982_s12  }
   0x8   : > { %p52_p0 = scmp.ne.s32.totalorder %s689_s13, %s685_s12  ;;  %p768_p1 = scmp.eq.s32.totalorder %s449_s18, 0 }
   0x9   : > { %p772_p2 = scmp.eq.s32.totalorder %s449_s18, 1  ;;  %p136_p3 = scmp.eq.s32.totalorder %s450_s19, 1 }
   0xa   : > { %s967_s20 = scalar_select %p768_p1, 1, 0 }
   0xb   : > { %s968_s21 = scalar_select %p772_p2, 1, 0 }
   0xc   : > { %p778_p4 = por %p768_p1, %p52_p0  ;;  %p451_p5 = scmp.ge.s32.totalorder %s705_s17, 1 }
   0xd   : > { %p783_p6 = por %p136_p3, %p52_p0  ;;  %p143_p7 = scmp.lt.s32.totalorder %s705_s17, 3 }
   0xe   : > { %s969_s22 = scalar_select %p778_p4, 1, 0 }
   0xf   : > { %s970_s23 = scalar_select %p783_p6, 1, 0 }
  0x10   : > { %p788_p8 = pnand %p451_p5, %p143_p7  ;;  %s707_s25 = smov [#allocation6]  }
  0x11   : > { %s157_s26 = sshll.u32 %s707_s25, 4  ;;  %s32_s28 = sadd.s32 1, %s701_s16  ;;  %s158_s26 = int_to_ptr.vmem [resolvable:$true] %s157_s26 }
  0x12   : > { %s971_s24 = scalar_select %p788_p8, 1, 0 }
  0x13   : > { %p488_p9 = pneg %p788_p8  ;;  %s561_s4 = scalar_lea.hbm %s960_s1, 256 }
  0x14   : > { %p562_p12 = scmp.ne.s32.totalorder %s960_s1, %s561_s4  ;;  %p568_p5 = scmp.lt.u32.totalorder %s561_s4, %s960_s1 }
  0x15   : > { %p797_p11 = pnand %p488_p9, %p768_p1 }
  0x17   : > { %p563_p13 = pneg %p797_p11 }
  0x19   : > { %p564_p0 = pnand %p563_p13, %p562_p12 }
  0x1b   : > { %p565_p3 = pneg %p564_p0 }
  0x1d   : > { %p570_p7 = pnand %p568_p5, %p565_p3 }
  0x1f   : > { %573 = shalt.err (!%p570_p7)
}
  0x20   : > { %s574_s9 = scalar_lea.vmem %s158_s26, 256  ;;  %p582_p1 = scmp.lt.s32.totalorder %s158_s26, %s158_s26 }
  0x21   : > { %p575_p9 = scmp.ne.s32.totalorder %s158_s26, %s574_s9  ;;  %p583_p4 = scmp.lt.s32.totalorder %s574_s9, %s574_s9 }
  0x23   : > { %p577_p10 = pnand %p575_p9, %p563_p13  ;;  %p584_p8 = por %p583_p4, %p582_p1 }
  0x25   : > { %p578_p6 = pneg %p577_p10 }
  0x27   : > { %p585_p2 = pnand %p584_p8, %p578_p6 }
  0x29   : > { %588 = shalt.err (!%p585_p2)
}
  0x2a   : > { %s708_s10 = smov 64   ;;  %s709_s11 = smov 4  }
  0x2b   : > { %491 = dma.hbm_to_vmem [thread:$0]  (!%p797_p11), %s960_s1, 256, %s158_s26, [#allocation7], %s708_s10, %s708_s10, %s709_s11  }
  0x2c   : > { %p34_p1 = scmp.ge.s32.totalorder %s32_s28, 2  ;;  %s39_s25 = sadd.s32 1, %s693_s14 }
  0x2d   : > { %p46_p2 = scmp.ne.s32.totalorder %s693_s14, %s689_s13  ;;  %p47_p4 = scmp.eq.s32.totalorder %s705_s17, 0 }
  0x2e   : > { %s988_s28 = smov (%p34_p1, %s32_s28), 0  ;;  %p974_p8 = scmp.ne.s32.totalorder %s968_s21, 0 }
  0x2f   : > { %p824_p6 = por %p47_p4, %p46_p2  ;;  %s36_s27 = ssub.s32 %s701_s16, %s988_s28 }
  0x30   : > { %p830_p10 = por %p974_p8, %p46_p2  ;;  %p501_p12 = scmp.lt.s32.totalorder %s705_s17, 2 }
  0x31   : > { %p37_p11 = scmp.eq.s32.totalorder %s36_s27, 0  ;;  %s177_s26 = sand.u32 1, %s693_s14  }
  0x32   : > { %s455_s4 = sshll.u32 %s177_s26, 3  ;;  %s456_s6 = sshll.u32 %s701_s16, 7 }
  0x33   : > { %s839_s5 = scalar_select %p37_p11, %s693_s14, %s39_s25  }
  0x34   : > { %s845_s9 = scalar_lea.hbm %s959_s0, %s456_s6  ;;  %s181_s21 = scalar_lea.vmem [#allocation3], %s455_s4 }
  0x35   : > { %s188_s10 = sshll.u32 %s181_s21, 4  ;;  %p851_p13 = pnand %p501_p12, %p824_p6  ;;  %s847_s10 = int_to_ptr.vmem [resolvable:$true] %s188_s10 }
  0x36   : > { %s178_s18 = scalar_lea.sflag [#allocation4], %s177_s26  ;;  %s589_s19 = scalar_lea.hbm %s845_s9, 128 }
  0x37   : > { %p590_p0 = scmp.ne.s32.totalorder %s845_s9, %s589_s19  ;;  %p591_p3 = pneg %p851_p13 }
  0x38   : > { %s594_s4 = scalar_lea.hbm %s959_s0, 256  ;;  %p595_p9 = scmp.lt.u32.totalorder %s845_s9, %s959_s0 }
  0x39   : > { %p592_p5 = pnand %p591_p3, %p590_p0  ;;  %p596_p1 = scmp.lt.u32.totalorder %s594_s4, %s589_s19 }
  0x3a   : > { %p598_p4 = scmp.lt.u32.totalorder %s589_s19, %s845_s9 }
  0x3b   : > { %p593_p7 = pneg %p592_p5  ;;  %p597_p2 = por %p596_p1, %p595_p9 }
  0x3d   : > { %p599_p6 = por %p598_p4, %p597_p2 }
  0x3f   : > { %p600_p8 = pnand %p599_p6, %p593_p7 }
  0x41   : > { %603 = shalt.err (!%p600_p8)
}
  0x42   : > { %s604_s26 = scalar_lea.vmem %s847_s10, 128  ;;  %s710_s7 = smov [#allocation3]  }
  0x43   : > { %p605_p12 = scmp.ne.s32.totalorder %s847_s10, %s604_s26  ;;  %s609_s8 = sshll.u32 %s710_s7, 4  ;;  %s610_s8 = int_to_ptr.vmem [resolvable:$false] %s609_s8 }
  0x44   : > { %s611_s21 = scalar_lea.vmem %s610_s8, 256  ;;  %p612_p5 = scmp.lt.s32.totalorder %s847_s10, %s610_s8 }
  0x45   : > { %p607_p11 = pnand %p605_p12, %p591_p3  ;;  %p613_p9 = scmp.lt.s32.totalorder %s611_s21, %s604_s26 }
  0x47   : > { %p608_p0 = pneg %p607_p11  ;;  %p614_p1 = por %p613_p9, %p612_p5 }
  0x49   : > { %p615_p2 = pnand %p614_p1, %p608_p0 }
  0x4b   : > { %618 = shalt.err (!%p615_p2)
}
  0x4c   : > { %495 = dma.hbm_to_vmem [thread:$0]  (!%p851_p13), %s845_s9, 128, %s847_s10, %s178_s18  }
  0x4d   : > { %p977_p7 = scmp.ne.s32.totalorder %s971_s24, 0 }
  0x4e   : > { %s883_s19 = sand.u32 (!%p977_p7), 1, %s689_s13   ;;  %p978_p3 = scmp.ne.s32.totalorder (!%p977_p7), %s969_s22, 0 }
  0x4f   : > { %197 = sbr.rel (%p977_p7) target bundleno = 497 (0x1f1), region = 32  ;;  %s458_s25 = sshll.u32 (!%p977_p7), %s883_s19, 3 }
  0x50   : > { %s200_s27 = scalar_lea.sflag (!%p977_p7), [#allocation4], %s883_s19  ;;  %s203_s4 = scalar_lea.vmem (!%p977_p7), [#allocation3], %s458_s25 }
  0x56   : > { %672 = dma.done.wait (%p978_p3), %s200_s27, 128  }
  0x57   : > { %674 = vsyncadd (%p978_p3), %s200_s27, 4294967168  ;;  %p979_p13 = scmp.ne.s32.totalorder %s967_s20, 0 }
  0x59   : > { %676 = dma.done.wait (%p979_p13), [#allocation7], 256  }
  0x5a   : > { %678 = vsyncadd (%p979_p13), [#allocation7], 4294967040  ;;  %vm242_vm0 = vcmask 261120   ;;  %v241_v0 = vld [vmem:[%s203_s4] sm:$0xff]  ;;  %v557_v4 = vld [vmem:[#allocation6] sm:$0xff]   ;;  %v711_v5 = vmov 0.0  }
  0x5b   : > { %v243_v1 = vsel %vm242_vm0, %v241_v0, 0.0  ;;  %v246_v2 = vmul.f32 %v241_v0, %v241_v0  ;;  %472 = vmatprep.subr.bf16.mxu0 %v711_v5  ;;  %v558_v6 = vld [vmem:[#allocation6 + $0x8] sm:$0xff]   ;;  %vm712_vm1 = vmmov 0   ;;  %vm260_vm2 = vcmask 257024   ;;  %s466_s24 = sshll.u32 %s697_s15, 7  ;;  %s232_s9 = scalar_lea.vmem [#allocation8], %s458_s25 }
  0x5c   : > { %244 = vadd.xlane.f32.xlu0 %v243_v1  ;;  %473 = vmatpush3.bf16.msra.mxu0 %v557_v4  ;;  %v461_v20 = vld [vmem:[%s961_s2] ss:$0 sm:$0xff]  ;;  %s346_s10 = sshll.u32 %s232_s9, 4  ;;  %s909_s29 = scalar_lea.hbm %s962_s3, %s466_s24  ;;  %s911_s10 = int_to_ptr.vmem [resolvable:$true] %s346_s10 }
  0x5d   : > { %v247_v3 = vsel %vm242_vm0, %v246_v2, 0.0  ;;  %476 = vmatprep.mubr.msk.bf16.mxu0 %vm712_vm1, %v711_v5  ;;  %474 = vmatprep.subr.bf16.mxu0 %v711_v5  ;;  %s332_s15 = scalar_lea.sflag [#allocation5], %s883_s19  ;;  %s619_s6 = scalar_lea.vmem %s911_s10, 128 }
  0x5e   : > { %p620_p4 = scmp.ne.s32.totalorder %s911_s10, %s619_s6  ;;  %s713_s26 = smov [#allocation8]  }
  0x5f   : > { %s623_s7 = sshll.u32 %s713_s26, 4  ;;  %s624_s7 = int_to_ptr.vmem [resolvable:$false] %s623_s7 }
  0x60   : > { %248 = vadd.xlane.f32.xlu0 %v247_v3  ;;  %475 = vmatpush3.bf16.msra.mxu0 %v558_v6  ;;  %p621_p6 = pnand %p620_p4, %p830_p10  ;;  %s625_s8 = scalar_lea.vmem %s624_s7, 256 }
  0x61   : > { %p626_p12 = scmp.lt.s32.totalorder %s911_s10, %s624_s7  ;;  %p627_p11 = scmp.lt.s32.totalorder %s625_s8, %s619_s6 }
  0x62   : > { %p622_p8 = pneg %p621_p6 }
  0x63   : > { %p628_p0 = por %p627_p11, %p626_p12 }
  0x65   : > { %p629_p5 = pnand %p628_p0, %p622_p8 }
  0xe9   : > { %v245_v7 = vpop.xlane.xlu0 %244 }
  0xea   : > { %v250_v8 = vmul.f32 0.03125, %v245_v7 }
  0xec   : > { %v252_v10 = vmul.f32 %v250_v8, %v250_v8  ;;  %v257_v15 = vsub.f32 %v241_v0, %v250_v8 }
  0xed   : > { %v249_v9 = vpop.xlane.xlu0 %248 }
  0xee   : > { %v251_v11 = vmul.f32 0.03125, %v249_v9 }
  0xf0   : > { %v253_v12 = vsub.f32 %v251_v11, %v252_v10 }
  0xf2   : > { %v254_v13 = vmax.f32 %v253_v12, 0.0 }
  0xf4   : > { %v255_v14 = vadd.f32 1e-12, %v254_v13 }
  0xf6   : > { %559 = vrsqrt.f32 %v255_v14 }
 0x100   : > { %v560_v16 = vpop.eup %559 }
 0x101   : > { %v258_v17 = vmul.f32 %v560_v16, %v257_v15 }
 0x103   : > { %v259_v18 = vpack.c.bf16 %v258_v17, %v258_v17 }
 0x105   : > { %261 = vst.msk [vmem:[#allocation2] sm:$0xf] %vm260_vm2, %v259_v18 }
 0x10c   : > { %v262_v19 = vld [vmem:[#allocation2] sm:$0xf] }
 0x10d   : > { %477 = vmatmul.mubr.msk.bf16.vlgmr.msra.gmra.mrb[0].mxu0 %vm242_vm0, %v262_v19 }
 0x1e0   : > { %v324_v21 = vpop.f32.mrb[0].mxu0 }
 0x1e1   : > { %v325_v22 = vadd.f32 %v461_v20, %v324_v21  ;;  %v478_v23 = vpop.f32.mrb[1].mxu0 }
 0x1e2   : > { %v327_v24 = vpop.f32.mrb[2].mxu0 }
 0x1e3   : > { %v479_v25 = vpop.f32.mrb[3].mxu0  ;;  %330 = vst.msk [vmem:[%s232_s9] sm:$0xff] %vm242_vm0, %v325_v22 }
 0x1e4   : > { %632 = shalt.err (!%p629_p5)
}
 0x1e5   : > { %s633_s21 = scalar_lea.hbm %s909_s29, 128  ;;  %s637_s27 = scalar_lea.hbm %s962_s3, 256 }
 0x1e6   : > { %p634_p9 = scmp.ne.s32.totalorder %s909_s29, %s633_s21  ;;  %p638_p7 = scmp.lt.u32.totalorder %s909_s29, %s962_s3 }
 0x1e7   : > { %p639_p3 = scmp.lt.u32.totalorder %s637_s27, %s633_s21  ;;  %p641_p4 = scmp.lt.u32.totalorder %s633_s21, %s909_s29 }
 0x1e8   : > { %p635_p1 = pnand %p634_p9, %p830_p10 }
 0x1e9   : > { %p640_p13 = por %p639_p3, %p638_p7 }
 0x1ea   : > { %p636_p2 = pneg %p635_p1 }
 0x1eb   : > { %p642_p6 = por %p641_p4, %p640_p13 }
 0x1ed   : > { %p643_p8 = pnand %p642_p6, %p636_p2 }
 0x1ef   : > { %646 = shalt.err (!%p643_p8)
}
 0x1f0   : > { %486 = dma.vmem_to_hbm [thread:$0]  (%p830_p10), %s911_s10, 128, %s909_s29, %s332_s15  }
 0x1f1 PF: > { %s358_s22 = sand.u32 1, %s685_s12   ;;  %p980_p12 = scmp.ne.s32.totalorder %s970_s23, 0 }
 0x1f2   : > { %p981_p11 = scmp.ge.s32.totalorder %s705_s17, 2  ;;  %s359_s24 = scalar_lea.sflag [#allocation5], %s358_s22 }
 0x1f4   : > { %p497_p0 = pnand %p981_p11, %p980_p12 }
 0x1f6   : > { %680 = dma.done.wait (!%p497_p0), %s359_s24, 128  }
 0x1f7   : > { %682 = vsyncadd (!%p497_p0), %s359_s24, 4294967168  ;;  %s20_s17 = sadd.s32 1, %s705_s17   ;;  %s982_s12 = smov %s689_s13 }
 0x1f8   : > { %p17_p5 = scmp.ge.s32.totalorder %s20_s17, 4   ;;  %s983_s13 = smov %s693_s14 }
 0x1f9   : > { %s984_s14 = smov %s839_s5  ;;  %s985_s15 = smov %s701_s16 }
 0x1fa   : > { %s986_s16 = smov %s988_s28  ;;  %19 = sbr.rel (!%p17_p5) target bundleno = 7 (0x7), region = 89 }
 0x201   :  { %364 = vsyncpa [#allocation4], 1 }
 0x202   :  { %366 = vsyncpa [#allocation4 + $0x1], 1 }
 0x203   :  { %367 = vsyncpa [#allocation7], 1 }
 0x204   :  { %368 = vsyncpa [#allocation5], 1 }
 0x205   :  { %370 = vsyncpa [#allocation5 + $0x1], 1 }

</bundles_post_ra>
